<compile_context>
chip_gen: v6e
topology: v6e:2x2x1
jax: 0.10.0
libtpu: 0.0.40
codegen_flags: <defaults>
</compile_context>

<pallas_src>
import jax
import jax.numpy as jnp
from jax.experimental import pallas as pl
from jax.experimental.pallas import tpu as pltpu

HIDDEN = 256


def _disc_kernel(x_ref, w1_ref, b1_ref, w2_ref, b2_ref, o_ref):
    # Layer 1: (TILE_B, D) @ (D, 256) on the MXU with f32 accumulation.
    h = jnp.dot(x_ref[...], w1_ref[...], preferred_element_type=jnp.float32)
    h = jnp.maximum(h + b1_ref[...], 0.0)                      # bias + ReLU (VPU)

    # Layer 2 has N=1: an MXU matmul would use 1/256 of the output columns and
    # pay a full MXU push/pop.  Do a VPU multiply + lane reduction instead —
    # it runs in otherwise-idle VLIW slots and overlaps the next tile's matmul.
    logit = jnp.sum(h * w2_ref[...], axis=-1, keepdims=True)   # (TILE_B, 1)
    logit = logit + b2_ref[0, 0]                               # scalar from SMEM
    o_ref[...] = jax.nn.sigmoid(logit).astype(o_ref.dtype)


def discriminator_forward(x, w1, b1, w2, b2, *, tile_b=1024):
    """x: (B, img_dim) f32 -> (B, 1) f32, matching the PyTorch Discriminator.

    tile_b: rows of x processed per grid step.  Default 1024 is safe on
    v5e/v6e/v7x; raise to 2048 (v7x) / 4096-8192 (v5e/v6e) for big batches.
    """
    B, D = x.shape
    H = w1.shape[1]

    # --- alignment / padding -------------------------------------------------
    # Feature axis -> multiple of 128 (lane axis / MXU K), zero padded.
    d_pad = 128 * pl.cdiv(D, 128)
    # Batch tile -> multiple of 8 (sublanes), no larger than the padded batch.
    tile_b = max(8, min(tile_b, 8 * pl.cdiv(B, 8)))
    b_pad = tile_b * pl.cdiv(B, tile_b)

    x_p = jnp.zeros((b_pad, d_pad), jnp.float32).at[:B, :D].set(x)
    w1_p = jnp.zeros((d_pad, H), jnp.float32).at[:D, :].set(w1)
    b1_r = b1.reshape(1, H)
    w2_row = w2.reshape(1, H)          # (256,1) -> (1,256) broadcast row
    b2_s = b2.reshape(1, 1)

    grid = (b_pad // tile_b,)

    out = pl.pallas_call(
        _disc_kernel,
        out_shape=jax.ShapeDtypeStruct((b_pad, 1), jnp.float32),
        grid=grid,
        in_specs=[
            # x: tiled over the batch axis -> double-buffered / pipelined.
            pl.BlockSpec((tile_b, d_pad), lambda i: (i, 0)),
            # Weights / biases: whole-array blocks, VMEM-resident across steps.
            pl.BlockSpec((d_pad, H), lambda i: (0, 0)),
            pl.BlockSpec((1, H), lambda i: (0, 0)),
            pl.BlockSpec((1, H), lambda i: (0, 0)),
            # b2 scalar via SMEM (avoids a padded (8,128) VMEM tile).
            pl.BlockSpec(memory_space=pltpu.MemorySpace.SMEM),
        ],
        out_specs=pl.BlockSpec((tile_b, 1), lambda i: (i, 0)),
        compiler_params=pltpu.CompilerParams(
            dimension_semantics=("parallel",),   # shard batch grid across TCs (v7x)
            vmem_limit_bytes=32 << 20,
        ),
    )(x_p, w1_p, b1_r, w2_row, b2_s)

    return out[:B]


def init_params(key, img_dim, hidden=HIDDEN):
    """Deterministic init mimicking PyTorch nn.Linear defaults
    (uniform(-1/sqrt(fan_in), 1/sqrt(fan_in)))."""
    k1, k2, k3, k4 = jax.random.split(key, 4)
    bound1 = 1.0 / jnp.sqrt(img_dim)
    bound2 = 1.0 / jnp.sqrt(hidden)
    # stored as (in, out) so the kernel does x @ W
    w1 = jax.random.uniform(k1, (img_dim, hidden), jnp.float32, -bound1, bound1)
    b1 = jax.random.uniform(k2, (1, hidden), jnp.float32, -bound1, bound1)
    w2 = jax.random.uniform(k3, (hidden, 1), jnp.float32, -bound2, bound2)
    b2 = jax.random.uniform(k4, (1, 1), jnp.float32, -bound2, bound2)
    return w1, b1, w2, b2


def _reference(x, w1, b1, w2, b2):
    return jax.nn.sigmoid(jnp.maximum(x @ w1 + b1, 0.0) @ w2 + b2)


if __name__ == "__main__":
    key = jax.random.PRNGKey(0)
    k_x, k_p, k_x2 = jax.random.split(key, 3)

    # Small shape consistent with the module (aligned case).
    B, IMG_DIM = 8, 64
    x = jax.random.normal(k_x, (B, IMG_DIM), dtype=jnp.float32)
    w1, b1, w2, b2 = init_params(k_p, IMG_DIM)

    out = jax.block_until_ready(discriminator_forward(x, w1, b1, w2, b2))
    ref = _reference(x, w1, b1, w2, b2)
    assert out.shape == (B, 1)
    assert jnp.allclose(out, ref, atol=1e-5, rtol=1e-5)

    # Unaligned shape exercising the grid + feature/batch padding path
    # (MNIST-like img_dim=784, batch not a multiple of the tile).
    B2, IMG_DIM2 = 100, 784
    x2 = jax.random.normal(k_x2, (B2, IMG_DIM2), dtype=jnp.float32)
    w1b, b1b, w2b, b2b = init_params(k_p, IMG_DIM2)
    out2 = jax.block_until_ready(
        discriminator_forward(x2, w1b, b1b, w2b, b2b, tile_b=32))
    ref2 = _reference(x2, w1b, b1b, w2b, b2b)
    assert out2.shape == (B2, 1)
    assert jnp.allclose(out2, ref2, atol=1e-5, rtol=1e-5)

    print("KERNEL_OK")
</pallas_src>

<mosaic_0001>
module attributes {stable_mosaic.version = 11 : i64} {
  func.func @_disc_kernel(%arg0: i32, %arg1: memref<8x128xf32, #tpu.memory_space<vmem>>, %arg2: memref<128x256xf32, #tpu.memory_space<vmem>>, %arg3: memref<1x256xf32, #tpu.memory_space<vmem>>, %arg4: memref<1x256xf32, #tpu.memory_space<vmem>>, %arg5: memref<1x1xf32, #tpu.memory_space<smem>>, %arg6: memref<8x1xf32, #tpu.memory_space<vmem>>) attributes {dimension_semantics = [#tpu.dimension_semantics<parallel>], iteration_bounds = array<i64: 1>, scalar_prefetch = 0 : i64, scratch_operands = 0 : i64, tpu.core_type = #tpu.core_type<tc>, window_params = [{transform_indices = @transform_0, window_bounds = array<i64: 8, 128>}, {pipeline_mode = #tpu.pipeline_mode<synchronous>, transform_indices = @transform_1, window_bounds = array<i64: 128, 256>}, {pipeline_mode = #tpu.pipeline_mode<synchronous>, transform_indices = @transform_2, window_bounds = array<i64: 1, 256>}, {pipeline_mode = #tpu.pipeline_mode<synchronous>, transform_indices = @transform_3, window_bounds = array<i64: 1, 256>}, {transform_indices = @transform_4, window_bounds = array<i64: 1, 1>}, {transform_indices = @transform_5, window_bounds = array<i64: 8, 1>}]} {
    %c0 = arith.constant 0 : index
    %c0_0 = arith.constant 0 : index
    %0 = vector.load %arg1[%c0, %c0_0] : memref<8x128xf32, #tpu.memory_space<vmem>>, vector<8x128xf32>
    %c0_1 = arith.constant 0 : index
    %c0_2 = arith.constant 0 : index
    %1 = vector.load %arg2[%c0_1, %c0_2] : memref<128x256xf32, #tpu.memory_space<vmem>>, vector<128x256xf32>
    %cst = arith.constant dense<0.000000e+00> : vector<8x256xf32>
    %2 = tpu.matmul %0, %1, %cst {dimension_numbers = #tpu.dot_dimension_numbers<[1], [0], [0], [1], [0, 0, 1, 1], [], []>} : vector<8x128xf32>, vector<128x256xf32>, vector<8x256xf32> -> vector<8x256xf32>
    %c0_3 = arith.constant 0 : index
    %c0_4 = arith.constant 0 : index
    %3 = vector.load %arg3[%c0_3, %c0_4] : memref<1x256xf32, #tpu.memory_space<vmem>>, vector<1x256xf32>
    %4 = vector.broadcast %3 : vector<1x256xf32> to vector<8x256xf32>
    %5 = arith.addf %2, %4 : vector<8x256xf32>
    %cst_5 = arith.constant 0.000000e+00 : f32
    %6 = vector.broadcast %cst_5 : f32 to vector<8x256xf32>
    %7 = arith.maximumf %5, %6 : vector<8x256xf32>
    %c0_6 = arith.constant 0 : index
    %c0_7 = arith.constant 0 : index
    %8 = vector.load %arg4[%c0_6, %c0_7] : memref<1x256xf32, #tpu.memory_space<vmem>>, vector<1x256xf32>
    %9 = vector.broadcast %8 : vector<1x256xf32> to vector<8x256xf32>
    %10 = arith.mulf %7, %9 : vector<8x256xf32>
    %cst_8 = arith.constant dense<0.000000e+00> : vector<8xf32>
    %11 = vector.multi_reduction <add>, %10, %cst_8 [1] : vector<8x256xf32> to vector<8xf32>
    %12 = vector.shape_cast %11 : vector<8xf32> to vector<8x1xf32>
    %c0_9 = arith.constant 0 : index
    %c0_10 = arith.constant 0 : index
    %13 = memref.load %arg5[%c0_9, %c0_10] : memref<1x1xf32, #tpu.memory_space<smem>>
    %14 = vector.broadcast %13 : f32 to vector<8x1xf32>
    %15 = arith.addf %12, %14 : vector<8x1xf32>
    %16 = arith.negf %15 : vector<8x1xf32>
    %17 = math.exp %16 : vector<8x1xf32>
    %cst_11 = arith.constant 1.000000e+00 : f32
    %18 = vector.broadcast %cst_11 : f32 to vector<8x1xf32>
    %19 = arith.addf %18, %17 : vector<8x1xf32>
    %20 = arith.divf %18, %19 : vector<8x1xf32>
    %c0_12 = arith.constant 0 : index
    %c0_13 = arith.constant 0 : index
    %21 = vector.load %arg6[%c0_12, %c0_13] : memref<8x1xf32, #tpu.memory_space<vmem>>, vector<8x1xf32>
    tpu.vector_store %arg6[%c0_12, %c0_13], %20 {strides = array<i32>} : memref<8x1xf32, #tpu.memory_space<vmem>>, vector<8x1xf32>,
    return
  }
  func.func @transform_0(%arg0: i32) -> (i32, i32) {
    %c0_i32 = arith.constant 0 : i32
    %c0_i32_0 = arith.constant 0 : i32
    return %arg0, %c0_i32 : i32, i32
  }
  func.func @transform_1(%arg0: i32) -> (i32, i32) {
    %c0_i32 = arith.constant 0 : i32
    %c0_i32_0 = arith.constant 0 : i32
    %c0_i32_1 = arith.constant 0 : i32
    return %c0_i32, %c0_i32_0 : i32, i32
  }
  func.func @transform_2(%arg0: i32) -> (i32, i32) {
    %c0_i32 = arith.constant 0 : i32
    %c0_i32_0 = arith.constant 0 : i32
    %c0_i32_1 = arith.constant 0 : i32
    return %c0_i32, %c0_i32_0 : i32, i32
  }
  func.func @transform_3(%arg0: i32) -> (i32, i32) {
    %c0_i32 = arith.constant 0 : i32
    %c0_i32_0 = arith.constant 0 : i32
    %c0_i32_1 = arith.constant 0 : i32
    return %c0_i32, %c0_i32_0 : i32, i32
  }
  func.func @transform_4(%arg0: i32) -> (i32, i32) {
    %c0_i32 = arith.constant 0 : i32
    %c0_i32_0 = arith.constant 0 : i32
    %c0_i32_1 = arith.constant 0 : i32
    return %c0_i32, %c0_i32_0 : i32, i32
  }
  func.func @transform_5(%arg0: i32) -> (i32, i32) {
    %c0_i32 = arith.constant 0 : i32
    %c0_i32_0 = arith.constant 0 : i32
    return %arg0, %c0_i32 : i32, i32
  }
}

</mosaic_0001>

<bundles_post_ra>
// kernel: tpu_custom_call.1
= control target key start
LH: loop header
LB: loop body
LE: loop exit
PB: predicated region body
PF: predicated region fallthrough
CT: control target
= control target key end

     0   :  { %11 = vsyncpa [#allocation4], 0  ;;  %s306_s0 = inlined_call_operand.hbm [shape: f32[8,128], index: 0, kind: input, shape index: {}]   ;;  %s307_s1 = inlined_call_operand.hbm [shape: f32[128,256], index: 1, kind: input, shape index: {}]   ;;  %s308_s2 = inlined_call_operand.vmem [shape: f32[1,256], index: 2, kind: input, shape index: {}]   ;;  %s309_s3 = inlined_call_operand.vmem [shape: f32[1,256], index: 3, kind: input, shape index: {}]   ;;  %s310_s4 = inlined_call_operand.<no memory space> [shape: f32[1,1], index: 4, kind: input, shape index: {}]   ;;  %s311_s5 = inlined_call_operand.vmem [shape: f32[8,1], index: 5, kind: output, shape index: {}]  }
   0x1   :  { %12 = vsyncpa [#allocation6], 0  ;;  %s253_s18 = smov [#allocation3]   ;;  %s254_s20 = smov [#allocation5]  }
   0x2   :  { %s19_s19 = sshll.u32 %s253_s18, 4  ;;  %s28_s21 = sshll.u32 %s254_s20, 4  ;;  %s20_s19 = int_to_ptr.vmem [resolvable:$true] %s19_s19  ;;  %s29_s21 = int_to_ptr.vmem [resolvable:$true] %s28_s21 }
   0x3   :  { %s217_s22 = scalar_lea.vmem %s20_s19, 128  ;;  %p222_p1 = scmp.lt.s32.totalorder %s20_s19, %s20_s19 }
   0x4   :  { %p218_p0 = scmp.ne.s32.totalorder %s20_s19, %s217_s22  ;;  %p223_p2 = scmp.lt.s32.totalorder %s217_s22, %s217_s22 }
   0x6   :  { %p224_p3 = por %p223_p2, %p222_p1 }
   0x8   :  { %p225_p4 = pnand %p224_p3, %p218_p0 }
   0xa   :  { %228 = shalt.err (!%p225_p4)
}
   0xb   :  { %22 = dma.hbm_to_vmem [thread:$0]  %s306_s0, 128, %s20_s19, [#allocation4]  }
   0xc   :  { %s237_s25 = scalar_lea.vmem %s29_s21, 4096  ;;  %p242_p6 = scmp.lt.s32.totalorder %s29_s21, %s29_s21 }
   0xd   :  { %p238_p5 = scmp.ne.s32.totalorder %s29_s21, %s237_s25  ;;  %p243_p7 = scmp.lt.s32.totalorder %s237_s25, %s237_s25 }
   0xf   :  { %p244_p8 = por %p243_p7, %p242_p6 }
  0x11   :  { %p245_p9 = pnand %p244_p8, %p238_p5 }
  0x13   :  { %248 = shalt.err (!%p245_p9)
}
  0x14   :  { %s255_s26 = smov 256   ;;  %s256_s27 = smov 16  }
  0x15   :  { %34 = dma.hbm_to_vmem [thread:$0]  %s307_s1, 4096, %s29_s21, [#allocation6], %s255_s26, %s255_s26, %s256_s27  }
  0x16   :  { %249 = dma.done.wait [#allocation4], 128  }
  0x17   :  { %250 = vsyncadd [#allocation4], 4294967168 }
  0x18   :  { %251 = dma.done.wait [#allocation6], 4096  }
  0x19   :  { %252 = vsyncadd [#allocation6], 4294963200  ;;  %v257_v0 = vmov 0.0   ;;  %v79_v1 = vld [vmem:[#allocation5 + $0xf8] sm:$0xff]  ;;  %v78_v2 = vld [vmem:[#allocation5 + $0xf0] sm:$0xff]  ;;  %v82_v34 = vlaneseq  ;;  %v183_v53 = vstv %s310_s4  ;;  %vm191_vm0 = vcmask 7168  }
  0x1a   :  { %156 = vmatprep.mubr.f32.mxu0 %v257_v0  ;;  %v77_v3 = vld [vmem:[#allocation5 + $0xe8] sm:$0xff]  ;;  %92 = vmatprep.subr.mxu0 %v79_v1  ;;  %v76_v4 = vld [vmem:[#allocation5 + $0xe0] sm:$0xff]  ;;  %v75_v5 = vld [vmem:[#allocation5 + $0xd8] sm:$0xff] }
  0x1b   :  { %93 = vmatpush1.msra.mxu0 %v78_v2  ;;  %v74_v6 = vld [vmem:[#allocation5 + $0xd0] sm:$0xff]  ;;  %v73_v7 = vld [vmem:[#allocation5 + $0xc8] sm:$0xff]  ;;  %v72_v8 = vld [vmem:[#allocation5 + $0xc0] sm:$0xff]  ;;  %v83_v35 = vshrl.u32 %v82_v34, 7 }
  0x1c   :  { %94 = vmatprep.subr.mxu0 %v77_v3  ;;  %v71_v9 = vld [vmem:[#allocation5 + $0xb8] sm:$0xff]  ;;  %v70_v10 = vld [vmem:[#allocation5 + $0xb0] sm:$0xff]  ;;  %v69_v11 = vld [vmem:[#allocation5 + $0xa8] sm:$0xff] }
  0x1d   :  { %95 = vmatpush1.msra.mxu0 %v76_v4  ;;  %v68_v12 = vld [vmem:[#allocation5 + $0xa0] sm:$0xff]  ;;  %v67_v13 = vld [vmem:[#allocation5 + $0x98] sm:$0xff]  ;;  %v66_v14 = vld [vmem:[#allocation5 + $0x90] sm:$0xff]  ;;  %v84_v36 = vsub.s32 0, %v83_v35  ;;  %v88_v38 = vsub.s32 1, %v83_v35 }
  0x1e   :  { %96 = vmatprep.subr.mxu0 %v75_v5  ;;  %v65_v15 = vld [vmem:[#allocation5 + $0x88] sm:$0xff]  ;;  %v64_v16 = vld [vmem:[#allocation5 + $0x80] sm:$0xff]  ;;  %v63_v17 = vld [vmem:[#allocation5 + $0x78] sm:$0xff] }
  0x1f   :  { %97 = vmatpush1.msra.mxu0 %v74_v6  ;;  %v62_v18 = vld [vmem:[#allocation5 + $0x70] sm:$0xff]  ;;  %v61_v19 = vld [vmem:[#allocation5 + $0x68] sm:$0xff]  ;;  %v60_v20 = vld [vmem:[#allocation5 + $0x60] sm:$0xff] }
  0x20   :  { %98 = vmatprep.subr.mxu0 %v73_v7  ;;  %v59_v21 = vld [vmem:[#allocation5 + $0x58] sm:$0xff]  ;;  %v58_v22 = vld [vmem:[#allocation5 + $0x50] sm:$0xff]  ;;  %v57_v23 = vld [vmem:[#allocation5 + $0x48] sm:$0xff] }
  0x21   :  { %99 = vmatpush1.msra.mxu0 %v72_v8  ;;  %v56_v24 = vld [vmem:[#allocation5 + $0x40] sm:$0xff]  ;;  %v55_v25 = vld [vmem:[#allocation5 + $0x38] sm:$0xff]  ;;  %v54_v26 = vld [vmem:[#allocation5 + $0x30] sm:$0xff] }
  0x22   :  { %100 = vmatprep.subr.mxu0 %v71_v9  ;;  %v53_v27 = vld [vmem:[#allocation5 + $0x28] sm:$0xff]  ;;  %v52_v28 = vld [vmem:[#allocation5 + $0x20] sm:$0xff]  ;;  %v51_v29 = vld [vmem:[#allocation5 + $0x18] sm:$0xff] }
  0x23   :  { %101 = vmatpush1.msra.mxu0 %v70_v10  ;;  %v50_v30 = vld [vmem:[#allocation5 + $0x10] sm:$0xff]  ;;  %v49_v31 = vld [vmem:[#allocation5 + $0x8] sm:$0xff]  ;;  %v48_v32 = vld [vmem:[#allocation5] sm:$0xff] }
  0x24   :  { %102 = vmatprep.subr.mxu0 %v69_v11  ;;  %v47_v33 = vld [vmem:[#allocation3] sm:$0xff] }
  0x25   :  { %103 = vmatpush1.msra.mxu0 %v68_v12  ;;  %v80_v37 = vld [vmem:[%s308_s2] sm:$0x3] }
  0x26   :  { %104 = vmatprep.subr.mxu0 %v67_v13  ;;  %v85_v39 = vrot.slane %v80_v37, %v84_v36  ;;  %v89_v40 = vrot.slane %v80_v37, %v88_v38  ;;  %v165_v42 = vld [vmem:[%s309_s3] sm:$0x3] }
  0x27   :  { %105 = vmatpush1.msra.mxu0 %v66_v14  ;;  %v170_v47 = vrot.slane %v165_v42, %v84_v36  ;;  %v174_v48 = vrot.slane %v165_v42, %v88_v38 }
  0x28   :  { %106 = vmatprep.subr.mxu0 %v65_v15 }
  0x29   :  { %107 = vmatpush1.msra.mxu0 %v64_v16 }
  0x2a   :  { %108 = vmatprep.subr.mxu0 %v63_v17 }
  0x2b   :  { %109 = vmatpush1.msra.mxu0 %v62_v18 }
  0x2c   :  { %110 = vmatprep.subr.mxu0 %v61_v19 }
  0x2d   :  { %111 = vmatpush1.msra.mxu0 %v60_v20 }
  0x2e   :  { %112 = vmatprep.subr.mxu0 %v59_v21 }
  0x2f   :  { %113 = vmatpush1.msra.mxu0 %v58_v22 }
  0x30   :  { %114 = vmatprep.subr.mxu0 %v57_v23 }
  0x31   :  { %115 = vmatpush1.msra.mxu0 %v56_v24 }
  0x32   :  { %116 = vmatprep.subr.mxu0 %v55_v25 }
  0x33   :  { %117 = vmatpush1.msra.mxu0 %v54_v26 }
  0x34   :  { %118 = vmatprep.subr.mxu0 %v53_v27 }
  0x35   :  { %119 = vmatpush1.msra.mxu0 %v52_v28 }
  0x36   :  { %120 = vmatprep.subr.mxu0 %v51_v29 }
  0x37   :  { %121 = vmatpush1.msra.mxu0 %v50_v30 }
  0x38   :  { %122 = vmatprep.subr.mxu0 %v49_v31 }
  0x39   :  { %123 = vmatpush1.msra.mxu0 %v48_v32 }
  0x3a   :  { %157 = vmatmul.mubr.f32.vlgmr.msra.gmra.mxu0 %v47_v33 }
  0xfa   :  { %v158_v41 = vpop.f32.mrf.mxu0 }
  0xfb   :  { %v159_v43 = vadd.f32 %v158_v41, %v85_v39 }
  0xfc   :  { %v160_v44 = vpop.f32.mrf.mxu0 }
  0xfd   :  { %v163_v45 = vmax.f32 %v159_v43, 0.0  ;;  %v161_v46 = vadd.f32 %v160_v44, %v89_v40 }
  0xff   :  { %v164_v49 = vmax.f32 %v161_v46, 0.0  ;;  %v177_v50 = vmul.f32 %v170_v47, %v163_v45 }
 0x101   :  { %v178_v51 = vmul.f32 %v174_v48, %v164_v49 }
 0x103   :  { %v179_v52 = vadd.f32 %v178_v51, %v177_v50 }
 0x105   :  { %180 = vadd.xlane.f32.xlu0 %v179_v52 }
 0x18e   :  { %v181_v54 = vpop.xlane.xlu0 %180 }
 0x18f   :  { %v184_v55 = vadd.f32 %v183_v53, %v181_v54 }
 0x191   :  { %v199_v56 = vmul.f32 -1.442695, %v184_v55 }
 0x193   :  { %205 = vpow2.f32 %v199_v56 }
 0x1a0   :  { %v206_v57 = vpop.eup %205 }
 0x1a1   :  { %v188_v58 = vadd.f32 1.0, %v206_v57 }
 0x1a3   :  { %207 = vrcp.f32 %v188_v58 }
 0x1b0   :  { %v208_v59 = vpop.eup %207 }
 0x1b1   :  { %192 = vst.msk [vmem:[%s311_s5] sm:$0xff] %vm191_vm0, %v208_v59 }
 0x1b2   :  { %197 = vsyncpa [#allocation4], 1 }
 0x1b3   :  { %198 = vsyncpa [#allocation6], 1 }

</bundles_post_ra>
